<compile_context>
chip_gen: v5e
topology: v5e:2x2
jax: 0.10.0
libtpu: 0.0.40
codegen_flags: <defaults>
</compile_context>

<pallas_src>
import jax
import jax.numpy as jnp
from jax.experimental import pallas as pl
from jax.experimental.pallas import tpu as pltpu


# -----------------------------------------------------------------------------
# Tiling configuration
# -----------------------------------------------------------------------------
_LANES = 1024                 # lane-dense last dim (multiple of 128)
_MAX_TILE_ROWS = 512          # 512 x 1024 x 4B = 2 MiB per f32 operand tile
_VMEM_LIMIT_BYTES = 32 * 1024 * 1024  # safe on v5e/v6e/v7x; ~12 MiB resident here


def _round_up(x, m):
    return ((x + m - 1) // m) * m


def _lane_dense_view(a, lanes, max_tile_rows):
    """Flatten `a`, zero-pad, and view it as a lane-dense (rows, lanes) slab.

    Returns (padded 2-D array, tile_rows).  tile_rows is a multiple of 8 and
    divides the padded row count, so every block is (tile_rows, lanes) with
    tile_rows % 8 == 0 and lanes % 128 == 0 (unmasked loads/stores).
    """
    flat = a.reshape(-1)
    n = flat.shape[0]
    rows = _round_up(max(n, 1), lanes) // lanes
    tile_rows = min(_round_up(rows, 8), max_tile_rows)
    rows_padded = _round_up(rows, tile_rows)
    padded_n = rows_padded * lanes
    if padded_n != n:
        flat = jnp.pad(flat, (0, padded_n - n))
    return flat.reshape(rows_padded, lanes), tile_rows


def _compiler_params():
    return pltpu.CompilerParams(
        dimension_semantics=("parallel",),      # shard row tiles across TCs (v7x)
        vmem_limit_bytes=_VMEM_LIMIT_BYTES,
    )


# -----------------------------------------------------------------------------
# Pallas kernels
# -----------------------------------------------------------------------------
def _residual_kernel(x_ref, t_ref, res_ref):
    # RobustModel.residual hot path: output - target (pure VPU, memory bound).
    res_ref[...] = x_ref[...] - t_ref[...]


def _rowgroup_sumsq(r):
    """VPU-only partial reduction of r**2 to an (8, lanes) block.

    Accumulates whole-vreg sublane-group slices (no cross-lane / cross-sublane
    XLU work in the hot loop); the tiny final reduce happens in the wrapper.
    """
    rf = r.astype(jnp.float32)            # cast in-kernel, under the DMA shadow
    r2 = rf * rf
    tr = r2.shape[0]
    acc = r2[0:8, :]
    for g in range(1, tr // 8):           # static, unrolled; whole-vreg adds
        acc = acc + r2[g * 8:(g + 1) * 8, :]
    return acc


def _loss_partial_kernel(x_ref, t_ref, psum_ref):
    psum_ref[...] = _rowgroup_sumsq(x_ref[...] - t_ref[...])


def _fused_kernel(x_ref, t_ref, res_ref, psum_ref):
    # One HBM pass: write residual tile and this tile's loss partials.
    r = x_ref[...] - t_ref[...]
    res_ref[...] = r
    psum_ref[...] = _rowgroup_sumsq(r)


# -----------------------------------------------------------------------------
# pallas_call wrappers
# -----------------------------------------------------------------------------
def _call_residual(x2d, t2d, tile_rows):
    rows, lanes = x2d.shape
    io_spec = pl.BlockSpec((tile_rows, lanes), lambda i: (i, 0))
    return pl.pallas_call(
        _residual_kernel,
        out_shape=jax.ShapeDtypeStruct((rows, lanes), x2d.dtype),
        grid_spec=pltpu.PrefetchScalarGridSpec(
            num_scalar_prefetch=0,
            grid=(rows // tile_rows,),
            in_specs=[io_spec, io_spec],
            out_specs=io_spec,
        ),
        compiler_params=_compiler_params(),
    )(x2d, t2d)


def _call_loss(x2d, t2d, tile_rows):
    rows, lanes = x2d.shape
    ntiles = rows // tile_rows
    io_spec = pl.BlockSpec((tile_rows, lanes), lambda i: (i, 0))
    psum_spec = pl.BlockSpec((8, lanes), lambda i: (i, 0))
    psum = pl.pallas_call(
        _loss_partial_kernel,
        out_shape=jax.ShapeDtypeStruct((ntiles * 8, lanes), jnp.float32),
        grid_spec=pltpu.PrefetchScalarGridSpec(
            num_scalar_prefetch=0,
            grid=(ntiles,),
            in_specs=[io_spec, io_spec],
            out_specs=psum_spec,
        ),
        compiler_params=_compiler_params(),
    )(x2d, t2d)
    return jnp.sum(psum)                  # tiny final reduce (ntiles*8 x lanes)


def _call_fused(x2d, t2d, tile_rows):
    rows, lanes = x2d.shape
    ntiles = rows // tile_rows
    io_spec = pl.BlockSpec((tile_rows, lanes), lambda i: (i, 0))
    psum_spec = pl.BlockSpec((8, lanes), lambda i: (i, 0))
    res2d, psum = pl.pallas_call(
        _fused_kernel,
        out_shape=(
            jax.ShapeDtypeStruct((rows, lanes), x2d.dtype),
            jax.ShapeDtypeStruct((ntiles * 8, lanes), jnp.float32),
        ),
        grid_spec=pltpu.PrefetchScalarGridSpec(
            num_scalar_prefetch=0,
            grid=(ntiles,),
            in_specs=[io_spec, io_spec],
            out_specs=(io_spec, psum_spec),
        ),
        compiler_params=_compiler_params(),
    )(x2d, t2d)
    return res2d, jnp.sum(psum)


# -----------------------------------------------------------------------------
# RobustModel API (model = Trivial, kernel = Trivial)
# -----------------------------------------------------------------------------
def trivial_model(x):
    # `Trivial` module: identity on a single positional argument.
    return x


def robust_model_forward(x, target, *, lanes=_LANES, max_tile_rows=_MAX_TILE_ROWS):
    """RobustModel.forward(input, target) -> tuple of residuals."""
    output = trivial_model(x)             # model_forward
    if target is None:                    # residual() passthrough
        return (output,)
    x2d, tile_rows = _lane_dense_view(output, lanes, max_tile_rows)
    t2d, _ = _lane_dense_view(target, lanes, max_tile_rows)
    res2d = _call_residual(x2d, t2d, tile_rows)
    n = output.size
    return (res2d.reshape(-1)[:n].reshape(output.shape),)


def robust_model_loss(x, target, *, lanes=_LANES, max_tile_rows=_MAX_TILE_ROWS):
    """RobustModel.loss with the default Trivial kernel:
    kernel(r.square().sum(-1)).sum() == sum of squared residuals (f32 accum)."""
    output = trivial_model(x)
    if target is None:
        x2d, tile_rows = _lane_dense_view(output, lanes, max_tile_rows)
        t2d = jnp.zeros_like(x2d)
        return _call_loss(x2d, t2d, tile_rows)
    x2d, tile_rows = _lane_dense_view(output, lanes, max_tile_rows)
    t2d, _ = _lane_dense_view(target, lanes, max_tile_rows)
    return _call_loss(x2d, t2d, tile_rows)


def robust_model_forward_and_loss(x, target, *, lanes=_LANES,
                                  max_tile_rows=_MAX_TILE_ROWS):
    """Fused residual + loss: one HBM pass when both results are consumed."""
    output = trivial_model(x)
    x2d, tile_rows = _lane_dense_view(output, lanes, max_tile_rows)
    t2d, _ = _lane_dense_view(target, lanes, max_tile_rows)
    res2d, loss = _call_fused(x2d, t2d, tile_rows)
    n = output.size
    return (res2d.reshape(-1)[:n].reshape(output.shape),), loss


# TODO(synk): flatten_row_jacobian / normalize_RWJ are host-side Jacobian &
# weight bookkeeping for the optimizer (torch.block_diag etc.), not part of
# the forward/loss pass, so they are not implemented as kernels here.

# -----------------------------------------------------------------------------
if __name__ == "__main__":
    key = jax.random.PRNGKey(0)
    k1, k2, k3, k4 = jax.random.split(key, 4)

    # Primary check: small shape implied by the module usage (seq=8, hidden=32).
    seq, hidden = 8, 32
    x = jax.random.normal(k1, (seq, hidden), dtype=jnp.float32)
    target = jax.random.normal(k2, (seq, hidden), dtype=jnp.float32)

    (res_fused,), loss_fused = robust_model_forward_and_loss(x, target)
    res_fused = jax.block_until_ready(res_fused)
    loss_fused = jax.block_until_ready(loss_fused)

    (res_fwd,) = robust_model_forward(x, target)
    res_fwd = jax.block_until_ready(res_fwd)
    loss_only = jax.block_until_ready(robust_model_loss(x, target))

    ref_res = x - target
    ref_loss = jnp.sum((x - target) ** 2)
    assert res_fused.shape == x.shape and res_fused.dtype == x.dtype
    assert jnp.allclose(res_fused, ref_res, atol=1e-6), "fused residual mismatch"
    assert jnp.allclose(res_fwd, ref_res, atol=1e-6), "residual mismatch"
    assert jnp.allclose(loss_fused, ref_loss, rtol=1e-5), "fused loss mismatch"
    assert jnp.allclose(loss_only, ref_loss, rtol=1e-5), "loss mismatch"

    # Secondary check: multi-tile grid + padding path (small tiles force grid > 1).
    seq2, hidden2 = 200, 130
    x2 = jax.random.normal(k3, (seq2, hidden2), dtype=jnp.float32)
    t2 = jax.random.normal(k4, (seq2, hidden2), dtype=jnp.float32)
    (res2,), loss2 = robust_model_forward_and_loss(
        x2, t2, lanes=256, max_tile_rows=64)
    res2 = jax.block_until_ready(res2)
    loss2 = jax.block_until_ready(loss2)
    assert jnp.allclose(res2, x2 - t2, atol=1e-6), "tiled residual mismatch"
    assert jnp.allclose(loss2, jnp.sum((x2 - t2) ** 2), rtol=1e-5), "tiled loss mismatch"

    print("KERNEL_OK")
</pallas_src>

<mosaic_0001>
module attributes {stable_mosaic.version = 11 : i64} {
  func.func @_fused_kernel(%arg0: i32, %arg1: memref<8x1024xf32, #tpu.memory_space<vmem>>, %arg2: memref<8x1024xf32, #tpu.memory_space<vmem>>, %arg3: memref<8x1024xf32, #tpu.memory_space<vmem>>, %arg4: memref<8x1024xf32, #tpu.memory_space<vmem>>) attributes {dimension_semantics = [#tpu.dimension_semantics<parallel>], iteration_bounds = array<i64: 1>, scalar_prefetch = 0 : i64, scratch_operands = 0 : i64, tpu.core_type = #tpu.core_type<tc>, window_params = [{transform_indices = @transform_0, window_bounds = array<i64: 8, 1024>}, {transform_indices = @transform_1, window_bounds = array<i64: 8, 1024>}, {transform_indices = @transform_2, window_bounds = array<i64: 8, 1024>}, {transform_indices = @transform_3, window_bounds = array<i64: 8, 1024>}]} {
    %c0 = arith.constant 0 : index
    %c0_0 = arith.constant 0 : index
    %0 = vector.load %arg1[%c0, %c0_0] : memref<8x1024xf32, #tpu.memory_space<vmem>>, vector<8x1024xf32>
    %c0_1 = arith.constant 0 : index
    %c0_2 = arith.constant 0 : index
    %1 = vector.load %arg2[%c0_1, %c0_2] : memref<8x1024xf32, #tpu.memory_space<vmem>>, vector<8x1024xf32>
    %2 = arith.subf %0, %1 : vector<8x1024xf32>
    %c0_3 = arith.constant 0 : index
    %c0_4 = arith.constant 0 : index
    %3 = vector.load %arg3[%c0_3, %c0_4] : memref<8x1024xf32, #tpu.memory_space<vmem>>, vector<8x1024xf32>
    tpu.vector_store %arg3[%c0_3, %c0_4], %2 {strides = array<i32>} : memref<8x1024xf32, #tpu.memory_space<vmem>>, vector<8x1024xf32>,
    %4 = arith.mulf %2, %2 : vector<8x1024xf32>
    %c0_5 = arith.constant 0 : index
    %c0_6 = arith.constant 0 : index
    %5 = vector.load %arg4[%c0_5, %c0_6] : memref<8x1024xf32, #tpu.memory_space<vmem>>, vector<8x1024xf32>
    tpu.vector_store %arg4[%c0_5, %c0_6], %4 {strides = array<i32>} : memref<8x1024xf32, #tpu.memory_space<vmem>>, vector<8x1024xf32>,
    return
  }
  func.func @transform_0(%arg0: i32) -> (i32, i32) {
    %c0_i32 = arith.constant 0 : i32
    %c0_i32_0 = arith.constant 0 : i32
    return %arg0, %c0_i32 : i32, i32
  }
  func.func @transform_1(%arg0: i32) -> (i32, i32) {
    %c0_i32 = arith.constant 0 : i32
    %c0_i32_0 = arith.constant 0 : i32
    return %arg0, %c0_i32 : i32, i32
  }
  func.func @transform_2(%arg0: i32) -> (i32, i32) {
    %c0_i32 = arith.constant 0 : i32
    %c0_i32_0 = arith.constant 0 : i32
    return %arg0, %c0_i32 : i32, i32
  }
  func.func @transform_3(%arg0: i32) -> (i32, i32) {
    %c0_i32 = arith.constant 0 : i32
    %c0_i32_0 = arith.constant 0 : i32
    return %arg0, %c0_i32 : i32, i32
  }
}

</mosaic_0001>

<bundles_post_ra>
// kernel: tpu_custom_call.1
= control target key start
LH: loop header
LB: loop body
LE: loop exit
PB: predicated region body
PF: predicated region fallthrough
CT: control target
= control target key end

     0   :  { %9 = vsyncpa [#allocation3], 0  ;;  %s269_s0 = inlined_call_operand.hbm [shape: f32[8,1024], index: 0, kind: input, shape index: {}]   ;;  %s270_s1 = inlined_call_operand.hbm [shape: f32[8,1024], index: 1, kind: input, shape index: {}]   ;;  %s271_s2 = inlined_call_operand.hbm [shape: f32[8,1024], index: 2, kind: output, shape index: {0}]   ;;  %s272_s3 = inlined_call_operand.hbm [shape: f32[8,1024], index: 3, kind: output, shape index: {1}]  }
   0x1   :  { %10 = vsyncpa [#allocation6], 0 }
   0x2   :  { %11 = vsyncpa [#allocation4], 0 }
   0x3   :  { %12 = vsyncpa [#allocation9], 0  ;;  %s18_s14 = sshll.u32 %s269_s0, 4  ;;  %s233_s15 = smov [#allocation2]   ;;  %s19_s14 = int_to_ptr.hbm [resolvable:$true] %s18_s14 }
   0x4   :  { %s20_s16 = sshll.u32 %s233_s15, 4  ;;  %s29_s19 = sshll.u32 %s270_s1, 4  ;;  %s21_s16 = int_to_ptr.vmem [resolvable:$true] %s20_s16  ;;  %s30_s19 = int_to_ptr.hbm [resolvable:$true] %s29_s19 }
   0x5   :  { %23 = dma.hbm_to_vmem [thread:$0]  %s19_s14, 1024, %s21_s16, [#allocation3]  }
   0x6   :  { %s234_s20 = smov [#allocation5]  }
   0x7   :  { %s31_s21 = sshll.u32 %s234_s20, 4  ;;  %s32_s21 = int_to_ptr.vmem [resolvable:$true] %s31_s21 }
   0x8   :  { %34 = dma.hbm_to_vmem [thread:$0]  %s30_s19, 1024, %s32_s21, [#allocation6]  }
   0x9   :  { %225 = dma.done.wait [#allocation3], 1024  }
   0xa   :  { %226 = vsyncadd [#allocation3], 4294966272 }
   0xb   :  { %227 = dma.done.wait [#allocation6], 1024  }
   0xc   :  { %228 = vsyncadd [#allocation6], 4294966272  ;;  %v43_v0 = vld [vmem:[#allocation2] sm:$0xff]  ;;  %v44_v2 = vld [vmem:[#allocation2 + $0x8] sm:$0xff]  ;;  %s235_s0 = smov [#allocation7]   ;;  %s98_s24 = sshll.u32 %s271_s2, 4  ;;  %s99_s24 = int_to_ptr.hbm [resolvable:$true] %s98_s24 }
   0xd   :  { %v51_v1 = vld [vmem:[#allocation5] sm:$0xff]  ;;  %v52_v4 = vld [vmem:[#allocation5 + $0x8] sm:$0xff]  ;;  %v45_v5 = vld [vmem:[#allocation2 + $0x10] sm:$0xff]  ;;  %s96_s1 = sshll.u32 %s235_s0, 4  ;;  %s236_s2 = smov [#allocation8]   ;;  %s97_s1 = int_to_ptr.vmem [resolvable:$true] %s96_s1 }
   0xe   :  { %v59_v3 = vsub.f32 %v43_v0, %v51_v1  ;;  %v53_v6 = vld [vmem:[#allocation5 + $0x10] sm:$0xff]  ;;  %v60_v7 = vsub.f32 %v44_v2, %v52_v4  ;;  %v46_v8 = vld [vmem:[#allocation2 + $0x18] sm:$0xff]  ;;  %v47_v10 = vld [vmem:[#allocation2 + $0x20] sm:$0xff]  ;;  %s107_s25 = sshll.u32 %s236_s2, 4  ;;  %s109_s28 = sshll.u32 %s272_s3, 4  ;;  %s108_s25 = int_to_ptr.vmem [resolvable:$true] %s107_s25  ;;  %s110_s28 = int_to_ptr.hbm [resolvable:$true] %s109_s28 }
   0xf   :  { %v54_v9 = vld [vmem:[#allocation5 + $0x18] sm:$0xff]  ;;  %v61_v11 = vsub.f32 %v45_v5, %v53_v6  ;;  %v55_v12 = vld [vmem:[#allocation5 + $0x20] sm:$0xff]  ;;  %v48_v13 = vld [vmem:[#allocation2 + $0x28] sm:$0xff] }
  0x10   :  { %67 = vst [vmem:[#allocation7] sm:$0xff] %v59_v3  ;;  %v56_v14 = vld [vmem:[#allocation5 + $0x28] sm:$0xff]  ;;  %v62_v15 = vsub.f32 %v46_v8, %v54_v9  ;;  %v49_v16 = vld [vmem:[#allocation2 + $0x30] sm:$0xff]  ;;  %v63_v18 = vsub.f32 %v47_v10, %v55_v12  ;;  %v50_v19 = vld [vmem:[#allocation2 + $0x38] sm:$0xff]  ;;  %v75_v23 = vmul.f32 %v59_v3, %v59_v3  ;;  %v76_v25 = vmul.f32 %v60_v7, %v60_v7 }
  0x11   :  { %68 = vst [vmem:[#allocation7 + $0x8] sm:$0xff] %v60_v7  ;;  %v57_v17 = vld [vmem:[#allocation5 + $0x30] sm:$0xff]  ;;  %v58_v20 = vld [vmem:[#allocation5 + $0x38] sm:$0xff]  ;;  %v64_v21 = vsub.f32 %v48_v13, %v56_v14  ;;  %v77_v26 = vmul.f32 %v61_v11, %v61_v11 }
  0x12   :  { %69 = vst [vmem:[#allocation7 + $0x10] sm:$0xff] %v61_v11  ;;  %v65_v22 = vsub.f32 %v49_v16, %v57_v17  ;;  %v66_v24 = vsub.f32 %v50_v19, %v58_v20  ;;  %v78_v27 = vmul.f32 %v62_v15, %v62_v15  ;;  %v79_v28 = vmul.f32 %v63_v18, %v63_v18 }
  0x13   :  { %70 = vst [vmem:[#allocation7 + $0x18] sm:$0xff] %v62_v15  ;;  %v80_v29 = vmul.f32 %v64_v21, %v64_v21 }
  0x14   :  { %71 = vst [vmem:[#allocation7 + $0x20] sm:$0xff] %v63_v18  ;;  %v81_v30 = vmul.f32 %v65_v22, %v65_v22  ;;  %v82_v31 = vmul.f32 %v66_v24, %v66_v24 }
  0x15   :  { %72 = vst [vmem:[#allocation7 + $0x28] sm:$0xff] %v64_v21 }
  0x16   :  { %73 = vst [vmem:[#allocation7 + $0x30] sm:$0xff] %v65_v22 }
  0x17   :  { %74 = vst [vmem:[#allocation7 + $0x38] sm:$0xff] %v66_v24 }
  0x18   :  { %83 = vst [vmem:[#allocation8] sm:$0xff] %v75_v23  ;;  %101 = dma.vmem_to_hbm [thread:$0]  %s97_s1, 1024, %s99_s24, [#allocation4]  }
  0x19   :  { %84 = vst [vmem:[#allocation8 + $0x8] sm:$0xff] %v76_v25 }
  0x1a   :  { %85 = vst [vmem:[#allocation8 + $0x10] sm:$0xff] %v77_v26 }
  0x1b   :  { %86 = vst [vmem:[#allocation8 + $0x18] sm:$0xff] %v78_v27 }
  0x1c   :  { %87 = vst [vmem:[#allocation8 + $0x20] sm:$0xff] %v79_v28 }
  0x1d   :  { %88 = vst [vmem:[#allocation8 + $0x28] sm:$0xff] %v80_v29 }
  0x1e   :  { %89 = vst [vmem:[#allocation8 + $0x30] sm:$0xff] %v81_v30 }
  0x1f   :  { %90 = vst [vmem:[#allocation8 + $0x38] sm:$0xff] %v82_v31 }
  0x20   :  { %112 = dma.vmem_to_hbm [thread:$0]  %s108_s25, 1024, %s110_s28, [#allocation9]  }
  0x21   :  { %229 = dma.done.wait [#allocation4], 1024  }
  0x22   :  { %230 = vsyncadd [#allocation4], 4294966272 }
  0x23   :  { %231 = dma.done.wait [#allocation9], 1024  }
  0x24   :  { %232 = vsyncadd [#allocation9], 4294966272 }
  0x25   :  { %121 = vsyncpa [#allocation3], 1 }
  0x26   :  { %122 = vsyncpa [#allocation6], 1 }
  0x27   :  { %123 = vsyncpa [#allocation4], 1 }
  0x28   :  { %124 = vsyncpa [#allocation9], 1 }

</bundles_post_ra>
